<compile_context>
chip_gen: v7x
topology: tpu7x:2x2x1
jax: 0.10.0
libtpu: 0.0.40
codegen_flags: <defaults>
</compile_context>

<pallas_src>
import functools

import numpy as np

import jax
import jax.numpy as jnp
from jax.experimental import pallas as pl
from jax.experimental.pallas import tpu as pltpu


# ---------------------------------------------------------------------------
# Pallas kernel: whole batch, all heads, one invocation
# ---------------------------------------------------------------------------
def _mha_kernel(q_ref, k_ref, v_ref, wqkv_ref, wouth_ref, bout_ref, mask_ref,
                out_ref, *, n_batch, seq_q, seq_k, n_heads, attn_size):
    nq = n_batch * seq_q
    nk = n_batch * seq_k
    ha = n_heads * attn_size

    # Stack q/k/v rows in VMEM (cheap, sublane-aligned copies) so the fused
    # projection is a single MXU matmul against [w_q*scale | w_k | w_v].
    x = jnp.concatenate([q_ref[...], k_ref[...], v_ref[...]], axis=0)
    proj = jnp.dot(x, wqkv_ref[...], preferred_element_type=jnp.float32)

    # Tile-aligned static slices of the fused projection result.
    fq = proj[:nq, :ha]                   # (nq, ha); 1/sqrt(a) already folded
    fk = proj[nq:nq + nk, ha:2 * ha]      # (nk, ha)
    fv = proj[nq + nk:, 2 * ha:]          # (nk, ha)

    fq = fq.reshape(nq, n_heads, attn_size)
    fk = fk.reshape(nk, n_heads, attn_size)
    fv = fv.reshape(nk, n_heads, attn_size)

    # Scores for the whole flattened batch, heads as the dot_general batch dim.
    s = jnp.einsum("qha,kha->hqk", fq, fk,
                   preferred_element_type=jnp.float32)        # (H, nq, nk)

    # Block-diagonal batch mask, baked at trace time (constant VMEM input):
    # a flattened query row may only attend to key rows of its own batch.
    s = s + mask_ref[...][None, :, :]

    # TODO(synk): mask / q_mask / k_mask inputs and the prob_attn=True
    # (sampled q/k) path of the PyTorch module are not implemented; for the
    # unmasked forward the clamp(min, max) in the reference is a no-op.

    # Numerically-stable softmax; reciprocal goes to the EUP slot.
    s = s - jnp.max(s, axis=-1, keepdims=True)
    e = jnp.exp(s)
    denom = jnp.sum(e, axis=-1, keepdims=True)
    ps = e * pl.reciprocal(denom, approx=True)

    # Keep the context head-major and fold the output projection into a
    # per-head batched matmul + head-sum: no h->middle transpose, no
    # (nq, H, a) -> (nq, H*a) lane-merge relayout.
    ctx = jnp.einsum("hqk,kha->hqa", ps, fv,
                     preferred_element_type=jnp.float32)      # (H, nq, a)
    out_h = jnp.einsum("hqa,hae->hqe", ctx, wouth_ref[...],
                       preferred_element_type=jnp.float32)    # (H, nq, E)

    # Leading-axis head sum as plain unrolled VPU adds (no XLU relayout).
    acc = out_h[0]
    for h in range(1, n_heads):
        acc = acc + out_h[h]

    out_ref[...] = acc + bout_ref[...]


# ---------------------------------------------------------------------------
# wrapper
# ---------------------------------------------------------------------------
@functools.partial(jax.jit, static_argnames=("n_heads", "attn_size"))
def multi_head_attention(q, k, v, kparams, *, n_heads, attn_size):
    B, Sq, E = q.shape
    Sk = k.shape[1]
    nq, nk = B * Sq, B * Sk

    # Trace-time numpy constant (shapes are static under jit): zero per-call
    # runtime cost; enters the kernel as a small constant VMEM input.
    row_b = np.arange(nq, dtype=np.int32)[:, None] // Sq
    col_b = np.arange(nk, dtype=np.int32)[None, :] // Sk
    mask = np.where(row_b == col_b, 0.0, -1e30).astype(np.float32)  # (nq, nk)

    # Metadata-only reshapes (no HBM copies).
    q2 = q.reshape(nq, E)
    k2 = k.reshape(nk, E)
    v2 = v.reshape(nk, E)

    kernel = functools.partial(
        _mha_kernel, n_batch=B, seq_q=Sq, seq_k=Sk,
        n_heads=n_heads, attn_size=attn_size)

    vmem = pl.BlockSpec(memory_space=pltpu.MemorySpace.VMEM)

    # No grid: the whole problem is a few KiB, a single invocation with
    # whole-array VMEM operands avoids pipeline prologue and double-buffering.
    # (On v7x, only introduce a 'parallel' batch/q-tile grid axis for the two
    # TensorCores once per-core work exceeds the ~0.35 us per-step overhead.)
    out = pl.pallas_call(
        kernel,
        out_shape=jax.ShapeDtypeStruct((nq, E), jnp.float32),
        in_specs=[vmem] * 7,
        out_specs=vmem,
    )(q2, k2, v2,
      kparams["w_qkv"], kparams["w_out_h"], kparams["b_out"], mask)

    return out.reshape(B, Sq, E)


# ---------------------------------------------------------------------------
# pure-JAX reference mirroring the PyTorch forward (unmasked, prob_attn=False)
# ---------------------------------------------------------------------------
def _mha_reference(q, k, v, p, n_heads, attn_size):
    B, Sq, _ = q.shape
    Sk = k.shape[1]
    fq = q @ p["w_q"]
    fk = k @ p["w_k"]
    fv = v @ p["w_v"]
    fq = fq.reshape(B, Sq, n_heads, attn_size).transpose(0, 2, 1, 3)
    fk = fk.reshape(B, Sk, n_heads, attn_size).transpose(0, 2, 3, 1)
    fv = fv.reshape(B, Sk, n_heads, attn_size).transpose(0, 2, 1, 3)
    f = jnp.matmul(fq, fk) / jnp.sqrt(jnp.float32(attn_size))
    ps = jax.nn.softmax(f, axis=-1)
    attns = jnp.matmul(ps, fv)                              # (B,H,Sq,a)
    attns = attns.transpose(0, 2, 1, 3).reshape(B, Sq, n_heads * attn_size)
    return attns @ p["w_out"] + p["b_out"]


# ---------------------------------------------------------------------------
# deterministic parameter construction (mirrors the module __init__)
# ---------------------------------------------------------------------------
def make_params(key, emb_size, attn_size, n_heads):
    ha = attn_size * n_heads
    xavier = jnp.sqrt(jnp.float32((emb_size + ha) / 2.0))
    keys = jax.random.split(key, 5)
    return {
        "w_q": jax.random.normal(keys[0], (emb_size, ha), jnp.float32) / xavier,
        "w_k": jax.random.normal(keys[1], (emb_size, ha), jnp.float32) / xavier,
        "w_v": jax.random.normal(keys[2], (emb_size, ha), jnp.float32) / xavier,
        # outs = nn.Linear(ha, emb_size); stored as (in, out) so y = x @ w + b.
        "w_out": (jax.random.normal(keys[3], (ha, emb_size), jnp.float32)
                  / jnp.sqrt(jnp.float32(ha))),
        "b_out": jax.random.normal(keys[4], (1, emb_size), jnp.float32) * 0.05,
    }


def prepare_kernel_params(params, n_heads, attn_size):
    """One-time (init-time) precompute of kernel-ready parameter forms.

    Folds the 1/sqrt(attn_size) score scale into w_q, concatenates the three
    projection weights into one (E, 3*H*a) matrix for the fused QKV matmul,
    and splits w_out per head for the batched output projection.  Done once
    here so the per-call jitted path contains only the pallas_call.
    """
    emb_size = params["w_q"].shape[0]
    scale = 1.0 / np.sqrt(float(attn_size))
    w_qkv = jnp.concatenate(
        [params["w_q"] * scale, params["w_k"], params["w_v"]], axis=1)
    w_out_h = params["w_out"].reshape(n_heads, attn_size, emb_size)
    return {"w_qkv": w_qkv, "w_out_h": w_out_h, "b_out": params["b_out"]}


if __name__ == "__main__":
    B, S, E = 2, 8, 32
    n_heads, attn_size = 8, 16        # n_heads * attn_size = 128

    key = jax.random.PRNGKey(0)
    kq, kk, kv, kp = jax.random.split(key, 4)
    q = jax.random.normal(kq, (B, S, E), jnp.float32)
    k = jax.random.normal(kk, (B, S, E), jnp.float32)
    v = jax.random.normal(kv, (B, S, E), jnp.float32)

    params = make_params(kp, E, attn_size, n_heads)
    kparams = prepare_kernel_params(params, n_heads, attn_size)
    kparams = jax.tree_util.tree_map(jax.block_until_ready, kparams)

    out = multi_head_attention(q, k, v, kparams,
                               n_heads=n_heads, attn_size=attn_size)
    out = jax.block_until_ready(out)

    ref = jax.block_until_ready(
        _mha_reference(q, k, v, params, n_heads, attn_size))

    assert out.shape == (B, S, E)
    # Tolerance accounts for the approximate EUP reciprocal in the softmax.
    assert jnp.allclose(out, ref, atol=5e-3, rtol=5e-3), "mismatch vs reference"
    print("KERNEL_OK")
</pallas_src>

<mosaic_0001>
module attributes {stable_mosaic.version = 11 : i64} {
  func.func @_mha_kernel(%arg0: memref<16x32xf32, #tpu.memory_space<vmem>>, %arg1: memref<16x32xf32, #tpu.memory_space<vmem>>, %arg2: memref<16x32xf32, #tpu.memory_space<vmem>>, %arg3: memref<32x384xf32, #tpu.memory_space<vmem>>, %arg4: memref<8x16x32xf32, #tpu.memory_space<vmem>>, %arg5: memref<1x32xf32, #tpu.memory_space<vmem>>, %arg6: memref<16x16xf32, #tpu.memory_space<vmem>>, %arg7: memref<16x32xf32, #tpu.memory_space<vmem>>) attributes {dimension_semantics = [], scalar_prefetch = 0 : i64, scratch_operands = 0 : i64, tpu.core_type = #tpu.core_type<tc>} {
    %c0 = arith.constant 0 : index
    %c0_0 = arith.constant 0 : index
    %0 = vector.load %arg0[%c0, %c0_0] : memref<16x32xf32, #tpu.memory_space<vmem>>, vector<16x32xf32>
    %c0_1 = arith.constant 0 : index
    %c0_2 = arith.constant 0 : index
    %1 = vector.load %arg1[%c0_1, %c0_2] : memref<16x32xf32, #tpu.memory_space<vmem>>, vector<16x32xf32>
    %c0_3 = arith.constant 0 : index
    %c0_4 = arith.constant 0 : index
    %2 = vector.load %arg2[%c0_3, %c0_4] : memref<16x32xf32, #tpu.memory_space<vmem>>, vector<16x32xf32>
    %3 = tpu.concatenate %0, %1, %2 in 0 : vector<16x32xf32>, vector<16x32xf32>, vector<16x32xf32> -> vector<48x32xf32>
    %c0_5 = arith.constant 0 : index
    %c0_6 = arith.constant 0 : index
    %4 = vector.load %arg3[%c0_5, %c0_6] : memref<32x384xf32, #tpu.memory_space<vmem>>, vector<32x384xf32>
    %cst = arith.constant dense<0.000000e+00> : vector<48x384xf32>
    %5 = tpu.matmul %3, %4, %cst {dimension_numbers = #tpu.dot_dimension_numbers<[1], [0], [0], [1], [0, 0, 1, 1], [], []>} : vector<48x32xf32>, vector<32x384xf32>, vector<48x384xf32> -> vector<48x384xf32>
    %6 = vector.extract_strided_slice %5 {offsets = [0, 0], sizes = [16, 128], strides = [1, 1]} : vector<48x384xf32> to vector<16x128xf32>
    %7 = vector.extract_strided_slice %5 {offsets = [16, 128], sizes = [16, 128], strides = [1, 1]} : vector<48x384xf32> to vector<16x128xf32>
    %8 = vector.extract_strided_slice %5 {offsets = [32, 256], sizes = [16, 128], strides = [1, 1]} : vector<48x384xf32> to vector<16x128xf32>
    %9 = vector.shape_cast %6 : vector<16x128xf32> to vector<16x8x16xf32>
    %10 = vector.shape_cast %7 : vector<16x128xf32> to vector<16x8x16xf32>
    %11 = vector.shape_cast %8 : vector<16x128xf32> to vector<16x8x16xf32>
    "tpu.trace_start"() <{level = 10 : i32, message = "qha,kha->hqk"}> : () -> ()
    %cst_7 = arith.constant dense<0.000000e+00> : vector<8x16x16xf32>
    %12 = tpu.matmul %9, %10, %cst_7 {dimension_numbers = #tpu.dot_dimension_numbers<[2], [2], [0], [0], [0, 1, 0, 0, 1, 0], [1], [1]>} : vector<16x8x16xf32>, vector<16x8x16xf32>, vector<8x16x16xf32> -> vector<8x16x16xf32>
    "tpu.trace_stop"() : () -> ()
    %c0_8 = arith.constant 0 : index
    %c0_9 = arith.constant 0 : index
    %13 = vector.load %arg6[%c0_8, %c0_9] : memref<16x16xf32, #tpu.memory_space<vmem>>, vector<16x16xf32>
    %14 = vector.shape_cast %13 : vector<16x16xf32> to vector<1x16x16xf32>
    %15 = vector.broadcast %14 : vector<1x16x16xf32> to vector<8x16x16xf32>
    %16 = arith.addf %12, %15 : vector<8x16x16xf32>
    %cst_10 = arith.constant dense<0xFF800000> : vector<8x16xf32>
    %17 = vector.multi_reduction <maximumf>, %16, %cst_10 [2] : vector<8x16x16xf32> to vector<8x16xf32>
    %18 = vector.shape_cast %17 : vector<8x16xf32> to vector<8x16x1xf32>
    %19 = vector.broadcast %18 : vector<8x16x1xf32> to vector<8x16x16xf32>
    %20 = arith.subf %16, %19 : vector<8x16x16xf32>
    %21 = math.exp %20 : vector<8x16x16xf32>
    %cst_11 = arith.constant dense<0.000000e+00> : vector<8x16xf32>
    %22 = vector.multi_reduction <add>, %21, %cst_11 [2] : vector<8x16x16xf32> to vector<8x16xf32>
    %23 = vector.shape_cast %22 : vector<8x16xf32> to vector<8x16x1xf32>
    %24 = tpu.reciprocal %23 {approx = true} : vector<8x16x1xf32> -> vector<8x16x1xf32>
    %25 = vector.broadcast %24 : vector<8x16x1xf32> to vector<8x16x16xf32>
    %26 = arith.mulf %21, %25 : vector<8x16x16xf32>
    "tpu.trace_start"() <{level = 10 : i32, message = "hqk,kha->hqa"}> : () -> ()
    %cst_12 = arith.constant dense<0.000000e+00> : vector<8x16x16xf32>
    %27 = tpu.matmul %26, %11, %cst_12 {dimension_numbers = #tpu.dot_dimension_numbers<[2], [0], [1], [2], [0, 0, 0, 1, 1, 2], [0], [1]>} : vector<8x16x16xf32>, vector<16x8x16xf32>, vector<8x16x16xf32> -> vector<8x16x16xf32>
    "tpu.trace_stop"() : () -> ()
    %c0_13 = arith.constant 0 : index
    %c0_14 = arith.constant 0 : index
    %c0_15 = arith.constant 0 : index
    %28 = vector.load %arg4[%c0_13, %c0_14, %c0_15] : memref<8x16x32xf32, #tpu.memory_space<vmem>>, vector<8x16x32xf32>
    "tpu.trace_start"() <{level = 10 : i32, message = "hqa,hae->hqe"}> : () -> ()
    %cst_16 = arith.constant dense<0.000000e+00> : vector<8x16x32xf32>
    %29 = tpu.matmul %27, %28, %cst_16 {dimension_numbers = #tpu.dot_dimension_numbers<[2], [1], [1], [2], [0, 0, 0, 1, 1, 2], [0], [0]>} : vector<8x16x16xf32>, vector<8x16x32xf32>, vector<8x16x32xf32> -> vector<8x16x32xf32>
    "tpu.trace_stop"() : () -> ()
    %30 = vector.extract_strided_slice %29 {offsets = [0, 0, 0], sizes = [1, 16, 32], strides = [1, 1, 1]} : vector<8x16x32xf32> to vector<1x16x32xf32>
    %31 = vector.shape_cast %30 : vector<1x16x32xf32> to vector<16x32xf32>
    %32 = vector.extract_strided_slice %29 {offsets = [1, 0, 0], sizes = [1, 16, 32], strides = [1, 1, 1]} : vector<8x16x32xf32> to vector<1x16x32xf32>
    %33 = vector.shape_cast %32 : vector<1x16x32xf32> to vector<16x32xf32>
    %34 = arith.addf %31, %33 : vector<16x32xf32>
    %35 = vector.extract_strided_slice %29 {offsets = [2, 0, 0], sizes = [1, 16, 32], strides = [1, 1, 1]} : vector<8x16x32xf32> to vector<1x16x32xf32>
    %36 = vector.shape_cast %35 : vector<1x16x32xf32> to vector<16x32xf32>
    %37 = arith.addf %34, %36 : vector<16x32xf32>
    %38 = vector.extract_strided_slice %29 {offsets = [3, 0, 0], sizes = [1, 16, 32], strides = [1, 1, 1]} : vector<8x16x32xf32> to vector<1x16x32xf32>
    %39 = vector.shape_cast %38 : vector<1x16x32xf32> to vector<16x32xf32>
    %40 = arith.addf %37, %39 : vector<16x32xf32>
    %41 = vector.extract_strided_slice %29 {offsets = [4, 0, 0], sizes = [1, 16, 32], strides = [1, 1, 1]} : vector<8x16x32xf32> to vector<1x16x32xf32>
    %42 = vector.shape_cast %41 : vector<1x16x32xf32> to vector<16x32xf32>
    %43 = arith.addf %40, %42 : vector<16x32xf32>
    %44 = vector.extract_strided_slice %29 {offsets = [5, 0, 0], sizes = [1, 16, 32], strides = [1, 1, 1]} : vector<8x16x32xf32> to vector<1x16x32xf32>
    %45 = vector.shape_cast %44 : vector<1x16x32xf32> to vector<16x32xf32>
    %46 = arith.addf %43, %45 : vector<16x32xf32>
    %47 = vector.extract_strided_slice %29 {offsets = [6, 0, 0], sizes = [1, 16, 32], strides = [1, 1, 1]} : vector<8x16x32xf32> to vector<1x16x32xf32>
    %48 = vector.shape_cast %47 : vector<1x16x32xf32> to vector<16x32xf32>
    %49 = arith.addf %46, %48 : vector<16x32xf32>
    %50 = vector.extract_strided_slice %29 {offsets = [7, 0, 0], sizes = [1, 16, 32], strides = [1, 1, 1]} : vector<8x16x32xf32> to vector<1x16x32xf32>
    %51 = vector.shape_cast %50 : vector<1x16x32xf32> to vector<16x32xf32>
    %52 = arith.addf %49, %51 : vector<16x32xf32>
    %c0_17 = arith.constant 0 : index
    %c0_18 = arith.constant 0 : index
    %53 = vector.load %arg5[%c0_17, %c0_18] : memref<1x32xf32, #tpu.memory_space<vmem>>, vector<1x32xf32>
    %54 = vector.broadcast %53 : vector<1x32xf32> to vector<16x32xf32>
    %55 = arith.addf %52, %54 : vector<16x32xf32>
    %c0_19 = arith.constant 0 : index
    %c0_20 = arith.constant 0 : index
    %56 = vector.load %arg7[%c0_19, %c0_20] : memref<16x32xf32, #tpu.memory_space<vmem>>, vector<16x32xf32>
    tpu.vector_store %arg7[%c0_19, %c0_20], %55 {strides = array<i32>} : memref<16x32xf32, #tpu.memory_space<vmem>>, vector<16x32xf32>,
    return
  }
}

</mosaic_0001>

<bundles_post_ra>
// kernel: multi_head_attention.1
= control target key start
LH: loop header
LB: loop body
LE: loop exit
PB: predicated region body
PF: predicated region fallthrough
CT: control target
= control target key end

     0   :  { %12 = vsyncpa [#allocation3], 0  ;;  %s4155_s0 = inlined_call_operand.hbm [shape: f32[16,32], index: 0, kind: input, shape index: {}]   ;;  %s4156_s1 = inlined_call_operand.hbm [shape: f32[16,32], index: 1, kind: input, shape index: {}]   ;;  %s4157_s2 = inlined_call_operand.hbm [shape: f32[16,32], index: 2, kind: input, shape index: {}]   ;;  %s4158_s3 = inlined_call_operand.hbm [shape: f32[32,384], index: 3, kind: input, shape index: {}]   ;;  %s4159_s4 = inlined_call_operand.hbm [shape: f32[8,16,32], index: 4, kind: input, shape index: {}]   ;;  %s4160_s5 = inlined_call_operand.vmem [shape: f32[1,32], index: 5, kind: input, shape index: {}]   ;;  %s4161_s6 = inlined_call_operand.vmem [shape: f32[16,16], index: 6, kind: input, shape index: {}]   ;;  %s4162_s7 = inlined_call_operand.hbm [shape: f32[16,32], index: 7, kind: output, shape index: {}]  }
   0x1   :  { %13 = vsyncpa [#allocation6], 0 }
   0x2   :  { %14 = vsyncpa [#allocation9], 0 }
   0x3   :  { %15 = vsyncpa [#allocation4], 0  ;;  %s3669_s24 = smov [#allocation5]   ;;  %s3670_s26 = smov [#allocation8]  }
   0x4   :  { %s33_s25 = sshll.u32 %s3669_s24, 4  ;;  %s57_s27 = sshll.u32 %s3670_s26, 4  ;;  %s34_s25 = int_to_ptr.vmem [resolvable:$true] %s33_s25  ;;  %s3727_s27 = int_to_ptr.vmem [resolvable:$true] %s57_s27 }
   0x5   :  { %s3529_s30 = scalar_lea.hbm %s4156_s1, 256 }
   0x6   :  { %p3530_p0 = scmp.ne.s32.totalorder %s4156_s1, %s3529_s30  ;;  %p3533_p1 = scmp.lt.u32.totalorder %s3529_s30, %s4156_s1 }
   0x8   :  { %p3535_p2 = pnand %p3533_p1, %p3530_p0 }
   0xa   :  { %3538 = shalt.err (!%p3535_p2)
}
   0xb   :  { %s3539_s12 = scalar_lea.vmem %s34_s25, 256  ;;  %p3544_p4 = scmp.lt.s32.totalorder %s34_s25, %s34_s25 }
   0xc   :  { %p3540_p3 = scmp.ne.s32.totalorder %s34_s25, %s3539_s12  ;;  %p3545_p5 = scmp.lt.s32.totalorder %s3539_s12, %s3539_s12 }
   0xe   :  { %p3546_p6 = por %p3545_p5, %p3544_p4 }
  0x10   :  { %p3547_p7 = pnand %p3546_p6, %p3540_p3 }
  0x12   :  { %3550 = shalt.err (!%p3547_p7)
}
  0x13   :  { %s3671_s13 = smov 128   ;;  %s3672_s14 = smov 8  }
  0x14   :  { %39 = dma.hbm_to_vmem [thread:$0]  %s4156_s1, 256, %s34_s25, [#allocation6], %s3671_s13, %s3671_s13, %s3672_s14  }
  0x15   :  { %s3551_s19 = scalar_lea.hbm %s4158_s3, 1536 }
  0x16   :  { %p3552_p8 = scmp.ne.s32.totalorder %s4158_s3, %s3551_s19  ;;  %p3555_p9 = scmp.lt.u32.totalorder %s3551_s19, %s4158_s3 }
  0x18   :  { %p3557_p10 = pnand %p3555_p9, %p3552_p8 }
  0x1a   :  { %3560 = shalt.err (!%p3557_p10)
}
  0x1b   :  { %s3561_s24 = scalar_lea.vmem %s3727_s27, 1536  ;;  %p3566_p12 = scmp.lt.s32.totalorder %s3727_s27, %s3727_s27 }
  0x1c   :  { %p3562_p11 = scmp.ne.s32.totalorder %s3727_s27, %s3561_s24  ;;  %p3567_p13 = scmp.lt.s32.totalorder %s3561_s24, %s3561_s24 }
  0x1e   :  { %p3568_p0 = por %p3567_p13, %p3566_p12 }
  0x20   :  { %p3569_p1 = pnand %p3568_p0, %p3562_p11 }
  0x22   :  { %3572 = shalt.err (!%p3569_p1)
}
  0x23   :  { %s3673_s1 = smov 384   ;;  %s3674_s25 = smov 24  }
  0x24   :  { %63 = dma.hbm_to_vmem [thread:$0]  %s4158_s3, 1536, %s3727_s27, [#allocation9], %s3673_s1, %s3673_s1, %s3674_s25  }
  0x25   :  { %s3675_s29 = smov [#allocation2]   ;;  %s3676_s8 = smov [#allocation7]  }
  0x26   :  { %s21_s30 = sshll.u32 %s3675_s29, 4  ;;  %s45_s9 = sshll.u32 %s3676_s8, 4  ;;  %s22_s30 = int_to_ptr.vmem [resolvable:$true] %s21_s30  ;;  %s3761_s9 = int_to_ptr.vmem [resolvable:$true] %s45_s9 }
  0x27   :  { %s3573_s12 = scalar_lea.hbm %s4155_s0, 256 }
  0x28   :  { %p3574_p2 = scmp.ne.s32.totalorder %s4155_s0, %s3573_s12  ;;  %p3577_p3 = scmp.lt.u32.totalorder %s3573_s12, %s4155_s0 }
  0x2a   :  { %p3579_p4 = pnand %p3577_p3, %p3574_p2 }
  0x2c   :  { %3582 = shalt.err (!%p3579_p4)
}
  0x2d   :  { %s3583_s3 = scalar_lea.vmem %s22_s30, 256  ;;  %p3588_p6 = scmp.lt.s32.totalorder %s22_s30, %s22_s30 }
  0x2e   :  { %p3584_p5 = scmp.ne.s32.totalorder %s22_s30, %s3583_s3  ;;  %p3589_p7 = scmp.lt.s32.totalorder %s3583_s3, %s3583_s3 }
  0x30   :  { %p3590_p8 = por %p3589_p7, %p3588_p6 }
  0x32   :  { %p3591_p9 = pnand %p3590_p8, %p3584_p5 }
  0x34   :  { %3594 = shalt.err (!%p3591_p9)
}
  0x35   :  { %27 = dma.hbm_to_vmem [thread:$0]  %s4155_s0, 256, %s22_s30, [#allocation3], %s3671_s13, %s3671_s13, %s3672_s14  }
  0x36   :  { %s3595_s22 = scalar_lea.hbm %s4157_s2, 256 }
  0x37   :  { %p3596_p10 = scmp.ne.s32.totalorder %s4157_s2, %s3595_s22  ;;  %p3599_p11 = scmp.lt.u32.totalorder %s3595_s22, %s4157_s2 }
  0x39   :  { %p3601_p12 = pnand %p3599_p11, %p3596_p10 }
  0x3b   :  { %3604 = shalt.err (!%p3601_p12)
}
  0x3c   :  { %s3605_s26 = scalar_lea.vmem %s3761_s9, 256  ;;  %p3610_p0 = scmp.lt.s32.totalorder %s3761_s9, %s3761_s9 }
  0x3d   :  { %p3606_p13 = scmp.ne.s32.totalorder %s3761_s9, %s3605_s26  ;;  %p3611_p1 = scmp.lt.s32.totalorder %s3605_s26, %s3605_s26 }
  0x3f   :  { %p3612_p2 = por %p3611_p1, %p3610_p0 }
  0x41   :  { %p3613_p3 = pnand %p3612_p2, %p3606_p13 }
  0x43   :  { %3616 = shalt.err (!%p3613_p3)
}
  0x44   :  { %51 = dma.hbm_to_vmem [thread:$0]  %s4157_s2, 256, %s3761_s9, [#allocation6], %s3671_s13, %s3671_s13, %s3672_s14  }
  0x45   :  { %s3677_s29 = smov [#allocation10]   ;;  %s3617_s11 = scalar_lea.hbm %s4159_s4, 2048 }
  0x46   :  { %s69_s30 = sshll.u32 %s3677_s29, 4  ;;  %p3618_p4 = scmp.ne.s32.totalorder %s4159_s4, %s3617_s11  ;;  %s70_s30 = int_to_ptr.vmem [resolvable:$true] %s69_s30 }
  0x47   :  { %p3621_p5 = scmp.lt.u32.totalorder %s3617_s11, %s4159_s4 }
  0x49   :  { %p3623_p6 = pnand %p3621_p5, %p3618_p4 }
  0x4b   :  { %3626 = shalt.err (!%p3623_p6)
}
  0x4c   :  { %s3627_s18 = scalar_lea.vmem %s70_s30, 2048  ;;  %p3632_p8 = scmp.lt.s32.totalorder %s70_s30, %s70_s30 }
  0x4d   :  { %p3628_p7 = scmp.ne.s32.totalorder %s70_s30, %s3627_s18  ;;  %p3633_p9 = scmp.lt.s32.totalorder %s3627_s18, %s3627_s18 }
  0x4f   :  { %p3634_p10 = por %p3633_p9, %p3632_p8 }
  0x51   :  { %p3635_p11 = pnand %p3634_p10, %p3628_p7 }
  0x53   :  { %3638 = shalt.err (!%p3635_p11)
}
  0x54   :  { %75 = dma.hbm_to_vmem [thread:$0]  %s4159_s4, 2048, %s70_s30, [#allocation9], %s3671_s13, %s3671_s13, %s3672_s14  }
  0x55   :  { %3661 = dma.done.wait [#allocation3], 256  }
  0x56   :  { %3662 = vsyncadd [#allocation3], 4294967040 }
  0x57   :  { %3663 = dma.done.wait [#allocation6], 512  }
  0x58   :  { %3664 = vsyncadd [#allocation6], 4294966784 }
  0x59   :  { %3665 = dma.done.wait [#allocation9], 3584  }
  0x5a   :  { %3666 = vsyncadd [#allocation9], 4294963712  ;;  %v3678_v0 = vmov 0.0   ;;  %v102_v1 = vld [vmem:[#allocation8 + $0x8] sm:$0xff]  ;;  %v105_v2 = vld [vmem:[#allocation8 + $0x20] sm:$0xff]  ;;  %vm113_vm0 = vcmask 261120  }
  0x5b   :  { %196 = vmatprep.mubr.f32.mxu0 %v3678_v0  ;;  %v101_v3 = vld [vmem:[#allocation8] sm:$0xff]  ;;  %v3209_v4 = vpack.c.bf16 %v105_v2, %v102_v1  ;;  %v104_v5 = vld [vmem:[#allocation8 + $0x18] sm:$0xff]  ;;  %v111_v7 = vld [vmem:[#allocation8 + $0x50] sm:$0xff]  ;;  %vm692_vm1 = vcmask 130048   ;;  %s3679_s4 = smov 96   ;;  %s3680_s3 = smov 112  }
  0x5c   :  { %v108_v6 = vld [vmem:[#allocation8 + $0x38] sm:$0xff]  ;;  %v3211_v8 = vpack.c.bf16 %v104_v5, %v101_v3  ;;  %v107_v10 = vld [vmem:[#allocation8 + $0x30] sm:$0xff]  ;;  %v110_v11 = vld [vmem:[#allocation8 + $0x48] sm:$0xff]  ;;  %s3681_s27 = smov 80   ;;  %s3682_s19 = smov 64  }
  0x5d   :  { %v3213_v9 = vpack.c.bf16 %v111_v7, %v108_v6  ;;  %3210 = vmatprep.subr.bf16.mxu0 %v3209_v4  ;;  %v3215_v12 = vpack.c.bf16 %v110_v11, %v107_v10  ;;  %v95_v13 = vld [vmem:[#allocation2] sm:$0xff]  ;;  %v96_v14 = vld [vmem:[#allocation2 + $0x8] sm:$0xff]  ;;  %v97_v15 = vld [vmem:[#allocation5] sm:$0xff]  ;;  %s3683_s20 = smov 48   ;;  %s3684_s21 = smov 16  }
  0x5e   :  { %3212 = vmatpush1.bf16.msra.mxu0 %v3211_v8  ;;  %v98_v16 = vld [vmem:[#allocation5 + $0x8] sm:$0xff]  ;;  %v99_v17 = vld [vmem:[#allocation7] sm:$0xff]  ;;  %v109_v21 = vld [vmem:[#allocation8 + $0x40] sm:$0xff]  ;;  %s3685_s22 = smov 32   ;;  %s3686_s0 = smov [#allocation11]  }
  0x5f   :  { %3214 = vmatprep.subr.bf16.mxu0 %v3213_v9  ;;  %v103_v18 = vld [vmem:[#allocation8 + $0x10] sm:$0xff]  ;;  %v106_v19 = vld [vmem:[#allocation8 + $0x28] sm:$0xff]  ;;  %v112_v22 = vld [vmem:[#allocation8 + $0x58] sm:$0xff]  ;;  %s2843_s28 = sshll.u32 %s3686_s0, 4  ;;  %s2844_s28 = int_to_ptr.vmem [resolvable:$true] %s2843_s28 }
  0x60   :  { %v3217_v20 = vpack.c.bf16 %v106_v19, %v103_v18  ;;  %v100_v23 = vld [vmem:[#allocation7 + $0x8] sm:$0xff]  ;;  %v3221_v24 = vpack.c.bf16 %v112_v22, %v109_v21  ;;  %s3639_s29 = scalar_lea.vmem %s2844_s28, 256  ;;  %p3644_p13 = scmp.lt.s32.totalorder %s2844_s28, %s2844_s28 }
  0x61   :  { %p3640_p12 = scmp.ne.s32.totalorder %s2844_s28, %s3639_s29  ;;  %p3645_p0 = scmp.lt.s32.totalorder %s3639_s29, %s3639_s29 }
  0x62   :  { %3216 = vmatpush1.bf16.msra.mxu0 %v3215_v12 }
  0x63   :  { %3218 = vmatprep.subr.bf16.mxu0 %v3217_v20  ;;  %p3646_p1 = por %p3645_p0, %p3644_p13 }
  0x65   :  { %2857 = vmatmul.mubr.msk.f32.vlgmr.msra.gmra.mrb[0].mxu0 %vm113_vm0, %v95_v13  ;;  %p3647_p2 = pnand %p3646_p1, %p3640_p12 }
  0x66   :  { %201 = vmatprep.mubr.f32.mxu0 %v3678_v0  ;;  %3220 = vmatpush3.bf16.msra.mxu0 %v3217_v20 }
  0x67   :  { %3222 = vmatprep.subr.bf16.mxu0 %v3221_v24 }
  0x69   :  { %2858 = vmatmul.mubr.msk.f32.gmra.mrb[2].mxu0 %vm113_vm0, %v96_v14 }
  0x6a   :  { %206 = vmatprep.mubr.f32.mxu0 %v3678_v0  ;;  %3224 = vmatpush3.bf16.msra.mxu0 %v3221_v24 }
  0x6d   :  { %2859 = vmatmul.mubr.msk.f32.gmra.mrb[4].mxu0 %vm113_vm0, %v97_v15 }
  0x6e   :  { %211 = vmatprep.mubr.f32.mxu0 %v3678_v0 }
  0x71   :  { %2860 = vmatmul.mubr.msk.f32.gmra.mrb[6].mxu0 %vm113_vm0, %v98_v16 }
  0x72   :  { %216 = vmatprep.mubr.f32.mxu0 %v3678_v0 }
  0x75   :  { %2861 = vmatmul.mubr.msk.f32.gmra.mrb[8].mxu0 %vm113_vm0, %v99_v17 }
  0x76   :  { %220 = vmatprep.mubr.f32.mxu0 %v3678_v0 }
  0x79   :  { %2862 = vmatmul.mubr.msk.f32.gmra.mrb[10].mxu0 %vm113_vm0, %v100_v23 }
  0x7a   :  { %3032 = vmatprep.mubr.msk.f32.mxu0 %vm113_vm0, %v95_v13 }
  0x7d   :  { %3033 = vmatmul.mubr.msk.f32.vlgmr.msra.gmra.mrb[12].mxu0 %vm113_vm0, %v96_v14 }
  0x7e   :  { %3035 = vmatprep.mubr.msk.f32.mxu0 %vm113_vm0, %v97_v15 }
  0x81   :  { %3036 = vmatmul.mubr.msk.f32.gmra.mrb[14].mxu0 %vm113_vm0, %v98_v16 }
  0x82   :  { %3038 = vmatprep.mubr.msk.f32.mxu0 %vm113_vm0, %v99_v17 }
  0x85   :  { %3039 = vmatmul.mubr.msk.f32.gmra.mrb[16].mxu0 %vm113_vm0, %v100_v23 }
 0x138   :  { %v3825_v25 = vpop.f32.mrb[0].mxu0 }
 0x139   :  { %322 = vrot.lane.b32.xlu1 %v3825_v25, %s3679_s4  ;;  %318 = vrot.lane.b32.xlu0 %v3825_v25, %s3680_s3  ;;  %v200_v26 = vpop.f32.mrb[1].mxu0 }
 0x13a   :  { %3045 = vmatprep.mubr.msk.f32.mxu1 %vm692_vm1, %v3825_v25 }
 0x13c   :  { %v3833_v27 = vpop.f32.mrb[2].mxu0 }
 0x13d   :  { %326 = vrot.lane.b32.xlu1 %v3825_v25, %s3681_s27  ;;  %332 = vrot.lane.b32.xlu0 %v3833_v27, %s3682_s19  ;;  %v205_v28 = vpop.f32.mrb[3].mxu0 }
 0x140   :  { %v208_v29 = vpop.f32.mrb[4].mxu0 }
 0x141   :  { %330 = vrot.lane.b32.xlu1 %v3825_v25, %s3682_s19  ;;  %336 = vrot.lane.b32.xlu0 %v3833_v27, %s3683_s20  ;;  %v209_v30 = vpop.f32.mrb[5].mxu0 }
 0x144   :  { %v213_v31 = vpop.f32.mrb[6].mxu0 }
 0x145   :  { %334 = vrot.lane.b32.xlu1 %v3825_v25, %s3683_s20  ;;  %v214_v32 = vpop.f32.mrb[7].mxu0 }
 0x146   :  { %v3353_v33 = vpack.i.bf16 %v214_v32, %v209_v30 }
 0x148   :  { %3354 = vrot.lane.b32.xlu0 %v3353_v33, %s3680_s3  ;;  %v218_v38 = vpop.f32.mrb[8].mxu0 }
 0x149   :  { %320 = vrot.lane.b32.xlu1 %v3833_v27, %s3680_s3  ;;  %v219_v39 = vpop.f32.mrb[9].mxu0 }
 0x14c   :  { %3359 = vrot.lane.b32.xlu0 %v3353_v33, %s3679_s4  ;;  %v222_v41 = vpop.f32.mrb[10].mxu0 }
 0x14d   :  { %324 = vrot.lane.b32.xlu1 %v3833_v27, %s3679_s4  ;;  %v223_v43 = vpop.f32.mrb[11].mxu0 }
 0x150   :  { %3374 = vrot.lane.b32.xlu0 %v3353_v33, %s3683_s20  ;;  %v3034_v48 = vpop.f32.mrb[12].mxu0 }
 0x151   :  { %328 = vrot.lane.b32.xlu1 %v3833_v27, %s3681_s27  ;;  %v291_v49 = vpop.f32.mrb[13].mxu0 }
 0x154   :  { %3384 = vrot.lane.b32.xlu0 %v3353_v33, %s3684_s21  ;;  %v3037_v53 = vpop.f32.mrb[14].mxu0 }
 0x155   :  { %3364 = vrot.lane.b32.xlu1 %v3353_v33, %s3681_s27  ;;  %v299_v54 = vpop.f32.mrb[15].mxu0 }
 0x158   :  { %v3885_v15 = vpop.f32.mrb[16].mxu0 }
 0x159   :  { %3369 = vrot.lane.b32.xlu1 %v3353_v33, %s3682_s19  ;;  %v3887_v16 = vpop.f32.mrb[17].mxu0 }
 0x15a   :  { %v3891_v17 = vpack.i.bf16 %v3885_v15, %v3887_v16 }
 0x15d   :  { %3379 = vrot.lane.b32.xlu1 %v3353_v33, %s3685_s22 }
 0x1ab   :  { %v3858_v34 = vpop.permute.xlu1 %322  ;;  %v3860_v35 = vpop.permute.xlu0 %318 }
 0x1af   :  { %v327_v36 = vpop.permute.xlu1 %326  ;;  %v3862_v37 = vpop.permute.xlu0 %332 }
 0x1b0   :  { %3066 = vmatprep.mubr.msk.f32.mxu0 %vm692_vm1, %v327_v36 }
 0x1b3   :  { %v3865_v40 = vpop.permute.xlu1 %330  ;;  %v3867_v42 = vpop.permute.xlu0 %336 }
 0x1b7   :  { %v3869_v44 = vpop.permute.xlu1 %334 }
 0x1ba   :  { %v3355_v45 = vpop.permute.xlu0 %3354 }
 0x1bb   :  { %v3356_v46 = vunpack.i.l.bf16 %v3355_v45  ;;  %v3871_v47 = vpop.permute.xlu1 %320  ;;  %v3357_v50 = vunpack.i.h.bf16 %v3355_v45 }
 0x1bd   :  { %v3388_v51 = vpack.i.bf16 %v3356_v46, %v209_v30  ;;  %v3390_v55 = vpack.i.bf16 %v3357_v50, %v214_v32 }
 0x1be   :  { %v3360_v57 = vpop.permute.xlu0 %3359 }
 0x1bf   :  { %v3873_v52 = vpop.permute.xlu1 %324  ;;  %3389 = vxpose.xlu0.b32.start [1/2] (short) (narrow) %v3388_v51, 16  ;;  %v3361_v59 = vunpack.i.l.bf16 %v3360_v57  ;;  %v3362_v63 = vunpack.i.h.bf16 %v3360_v57  ;;  %v435_v57 = vld [vmem:[%s4161_s6 + $0x8] sm:$0xff] }
 0x1c2   :  { %v3375_v2 = vpop.permute.xlu0 %3374 }
 0x1c3   :  { %v3875_v56 = vpop.permute.xlu1 %328  ;;  %3391 = vxpose.xlu0.b32.end [2/2] (short) (narrow) %v3390_v55, 16  ;;  %v3376_v4 = vunpack.i.l.bf16 %v3375_v2  ;;  %v3377_v7 = vunpack.i.h.bf16 %v3375_v2 }
 0x1c6   :  { %v3385_v9 = vpop.permute.xlu0 %3384 }
 0x1c7   :  { %v3365_v58 = vpop.permute.xlu1 %3364  ;;  %v3386_v10 = vunpack.i.l.bf16 %v3385_v9  ;;  %v3387_v11 = vunpack.i.h.bf16 %v3385_v9 }
 0x1c8   :  { %v3366_v60 = vunpack.i.l.bf16 %v3365_v58  ;;  %v3367_v61 = vunpack.i.h.bf16 %v3365_v58  ;;  %v434_v58 = vld [vmem:[%s4161_s6] sm:$0xff] }
 0x1ca   :  { %v3402_v62 = vpack.i.bf16 %v3366_v60, %v3361_v59  ;;  %v3404_v0 = vpack.i.bf16 %v3367_v61, %v3362_v63 }
 0x1cb   :  { %v3370_v1 = vpop.permute.xlu1 %3369 }
 0x1cc   :  { %3403 = vxpose.xlu1.b32.start [1/2] (short) (narrow) %v3402_v62, 16  ;;  %v3371_v3 = vunpack.i.l.bf16 %v3370_v1  ;;  %v3372_v5 = vunpack.i.h.bf16 %v3370_v1 }
 0x1ce   :  { %v3416_v6 = vpack.i.bf16 %v3376_v4, %v3371_v3  ;;  %v3418_v8 = vpack.i.bf16 %v3377_v7, %v3372_v5 }
 0x1cf   :  { %v3380_v12 = vpop.permute.xlu1 %3379 }
 0x1d0   :  { %3405 = vxpose.xlu1.b32.end [2/2] (short) (narrow) %v3404_v0, 16  ;;  %v3381_v13 = vunpack.i.l.bf16 %v3380_v12  ;;  %v3382_v14 = vunpack.i.h.bf16 %v3380_v12 }
 0x1ec   :  { %338 = vrot.lane.b32.xlu0 %v3825_v25, %s3685_s22 }
 0x1ee   :  { %340 = vrot.lane.b32.xlu1 %v3833_v27, %s3685_s22 }
 0x1f2   :  { %342 = vrot.lane.b32.xlu1 %v3825_v25, %s3684_s21 }
 0x1f6   :  { %344 = vrot.lane.b32.xlu1 %v3833_v27, %s3684_s21 }
 0x20a   :  { %3417 = vxpose.xlu0.b32.start [1/2] (short) (narrow) %v3416_v6, 16 }
 0x20e   :  { %3419 = vxpose.xlu0.b32.end [2/2] (short) (narrow) %v3418_v8, 16 }
 0x212   :  { %660 = vxpose.xlu0.b32.start [1/2] (short) (narrow) %v3386_v10, 16 }
 0x216   :  { %661 = vxpose.xlu0.b32.end [2/2] (short) (narrow) %v3387_v11, 16 }
 0x21f   :  { %628 = vxpose.xlu1.b32.start [1/2] (short) (narrow) %v3381_v13, 16 }
 0x223   :  { %629 = vxpose.xlu1.b32.end [2/2] (short) (narrow) %v3382_v14, 16 }
 0x23f   :  { %v3392_v18 = vpop.trf.xlu0  ;;  %3431 = vrot.lane.b32.xlu0 %v3891_v17, %s3680_s3 }
 0x240   :  { %v3396_v19 = vunpack.i.h.bf16 %v3392_v18  ;;  %v3393_v20 = vunpack.i.l.bf16 %v3392_v18 }
 0x243   :  { %v3397_v21 = vpop.trf.xlu0 }
 0x244   :  { %v3401_v22 = vunpack.i.h.bf16 %v3397_v21  ;;  %v3398_v23 = vunpack.i.l.bf16 %v3397_v21 }
 0x246   :  { %v3225_v24 = vpack.c.bf16 %v3398_v23, %v3393_v20  ;;  %v3229_v25 = vpack.c.bf16 %v3401_v22, %v3396_v19 }
 0x248   :  { %3226 = vmatprep.subr.bf16.mxu1 %v3225_v24 }
 0x249   :  { %3228 = vmatpush3.bf16.msra.mxu1 %v3225_v24 }
 0x24a   :  { %3230 = vmatprep.subr.bf16.mxu1 %v3229_v25 }
 0x24c   :  { %v3406_v26 = vpop.trf.xlu1  ;;  %3046 = vmatmul.mubr.msk.f32.vlgmr.msra.gmra.mrb[0].mxu1 %vm692_vm1, %v3833_v27 }
 0x24d   :  { %3232 = vmatpush3.bf16.msra.mxu1 %v3229_v25  ;;  %3052 = vmatprep.mubr.msk.f32.mxu1 %vm692_vm1, %v3860_v35  ;;  %v3410_v28 = vunpack.i.h.bf16 %v3406_v26  ;;  %v3407_v29 = vunpack.i.l.bf16 %v3406_v26 }
 0x250   :  { %v3411_v30 = vpop.trf.xlu1  ;;  %3053 = vmatmul.mubr.msk.f32.vlgmr.msra.gmra.mrb[2].mxu1 %vm692_vm1, %v3871_v47 }
 0x251   :  { %v3415_v31 = vunpack.i.h.bf16 %v3411_v30  ;;  %v3412_v32 = vunpack.i.l.bf16 %v3411_v30  ;;  %3059 = vmatprep.mubr.msk.f32.mxu1 %vm692_vm1, %v3858_v34 }
 0x253   :  { %v3233_v33 = vpack.c.bf16 %v3412_v32, %v3407_v29  ;;  %v3237_v36 = vpack.c.bf16 %v3415_v31, %v3410_v28 }
 0x255   :  { %3234 = vmatprep.subr.bf16.mxu1 %v3233_v33  ;;  %3238 = vmatprep.subr.bf16.mxu0 %v3237_v36 }
 0x256   :  { %3236 = vmatpush3.bf16.msra.mxu1 %v3233_v33  ;;  %3240 = vmatpush3.bf16.msra.mxu0 %v3237_v36 }
 0x259   :  { %3060 = vmatmul.mubr.msk.f32.vlgmr.msra.gmra.mrb[4].mxu1 %vm692_vm1, %v3873_v52  ;;  %3067 = vmatmul.mubr.msk.f32.vlgmr.msra.gmra.mrb[18].mxu0 %vm692_vm1, %v3875_v56 }
 0x25a   :  { %3073 = vmatprep.mubr.msk.f32.mxu1 %vm692_vm1, %v3865_v40  ;;  %3080 = vmatprep.mubr.msk.f32.mxu0 %vm692_vm1, %v3869_v44 }
 0x25e   :  { %v339_v27 = vpop.permute.xlu0 %338 }
 0x260   :  { %v341_v41 = vpop.permute.xlu1 %340 }
 0x264   :  { %v343_v49 = vpop.permute.xlu1 %342 }
 0x268   :  { %v345_v44 = vpop.permute.xlu1 %344 }
 0x28a   :  { %v3420_v34 = vpop.trf.xlu0 }
 0x28b   :  { %v3424_v35 = vunpack.i.h.bf16 %v3420_v34  ;;  %v3421_v38 = vunpack.i.l.bf16 %v3420_v34 }
 0x28e   :  { %v3425_v39 = vpop.trf.xlu0 }
 0x28f   :  { %v3429_v43 = vunpack.i.h.bf16 %v3425_v39  ;;  %v3426_v45 = vunpack.i.l.bf16 %v3425_v39 }
 0x291   :  { %v3241_v46 = vpack.c.bf16 %v3426_v45, %v3421_v38  ;;  %v3245_v47 = vpack.c.bf16 %v3429_v43, %v3424_v35 }
 0x292   :  { %v676_v48 = vpop.trf.xlu0 }
 0x293   :  { %3242 = vmatprep.subr.bf16.mxu1 %v3241_v46  ;;  %3246 = vmatprep.subr.bf16.mxu0 %v3245_v47 }
 0x294   :  { %3244 = vmatpush3.bf16.msra.mxu1 %v3241_v46  ;;  %3248 = vmatpush3.bf16.msra.mxu0 %v3245_v47 }
 0x296   :  { %v677_v40 = vpop.trf.xlu0 }
 0x297   :  { %v3253_v50 = vpack.c.bf16 %v677_v40, %v676_v48  ;;  %3074 = vmatmul.mubr.msk.f32.vlgmr.msra.gmra.mrb[6].mxu1 %vm692_vm1, %v3862_v37  ;;  %3081 = vmatmul.mubr.msk.f32.vlgmr.msra.gmra.mrb[20].mxu0 %vm692_vm1, %v3867_v42  ;;  %v3257_v37 = vpack.c.bf16 %v3885_v15, %v3887_v16 }
 0x298   :  { %3087 = vmatprep.mubr.msk.f32.mxu1 %vm692_vm1, %v339_v27  ;;  %3094 = vmatprep.mubr.msk.f32.mxu0 %vm692_vm1, %v343_v49 }
 0x299   :  { %3254 = vmatprep.subr.bf16.mxu0 %v3253_v50 }
 0x29a   :  { %3256 = vmatpush3.bf16.msra.mxu0 %v3253_v50 }
 0x29d   :  { %3095 = vmatmul.mubr.msk.f32.vlgmr.msra.gmra.mrb[22].mxu0 %vm692_vm1, %v345_v44 }
 0x29f   :  { %v644_v51 = vpop.trf.xlu1 }
 0x2a3   :  { %v645_v52 = vpop.trf.xlu1 }
 0x2a4   :  { %v3249_v53 = vpack.c.bf16 %v645_v52, %v644_v51 }
 0x2a6   :  { %3250 = vmatprep.subr.bf16.mxu1 %v3249_v53 }
 0x2a7   :  { %3252 = vmatpush3.bf16.msra.mxu1 %v3249_v53 }
 0x2a8   :  { %3258 = vmatprep.subr.bf16.mxu1 %v3257_v37 }
 0x2aa   :  { %3088 = vmatmul.mubr.msk.f32.vlgmr.msra.gmra.mrb[8].mxu1 %vm692_vm1, %v341_v41 }
 0x2ab   :  { %3260 = vmatpush3.bf16.msra.mxu1 %v3257_v37 }
 0x2b1   :  { %v3432_v42 = vpop.permute.xlu0 %3431 }
 0x2b2   :  { %v3434_v54 = vunpack.i.h.bf16 %v3432_v42  ;;  %v3433_v55 = vunpack.i.l.bf16 %v3432_v42 }
 0x2b4   :  { %v3261_v56 = vpack.c.bf16 %v3434_v54, %v3433_v55 }
 0x2b6   :  { %3262 = vmatprep.subr.bf16.mxu0 %v3261_v56 }
 0x2b7   :  { %3264 = vmatpush3.bf16.msra.mxu0 %v3261_v56 }
 0x31f   :  { %v3047_v59 = vpop.f32.mrb[0].mxu1 }
 0x320   :  { %v3927_v60 = vadd.f32 %v3047_v59, %v435_v57  ;;  %v763_v61 = vpop.f32.mrb[1].mxu1 }
 0x321   :  { %v3929_v62 = vadd.f32 %v763_v61, %v434_v58 }
 0x322   :  { %v1328_v63 = vsel %vm692_vm1, %v3927_v60, -inf }
 0x323   :  { %1329 = vmax.xlane.f32.xlu1 %v1328_v63  ;;  %v3054_v0 = vpop.f32.mrb[2].mxu1  ;;  %v1325_v1 = vsel %vm692_vm1, %v3929_v62, -inf }
 0x324   :  { %v3935_v2 = vadd.f32 %v3054_v0, %v435_v57  ;;  %v842_v3 = vpop.f32.mrb[3].mxu1  ;;  %1326 = vmax.xlane.f32.xlu0 %v1325_v1 }
 0x325   :  { %v3939_v5 = vadd.f32 %v842_v3, %v434_v58 }
 0x326   :  { %v1334_v4 = vsel %vm692_vm1, %v3935_v2, -inf }
 0x327   :  { %v1331_v6 = vsel %vm692_vm1, %v3939_v5, -inf }
 0x328   :  { %1335 = vmax.xlane.f32.xlu0 %v1334_v4 }
 0x32c   :  { %v3061_v7 = vpop.f32.mrb[4].mxu1  ;;  %1332 = vmax.xlane.f32.xlu0 %v1331_v6  ;;  %v3068_v8 = vpop.f32.mrb[18].mxu0 }
 0x32d   :  { %v921_v9 = vpop.f32.mrb[5].mxu1  ;;  %v1000_v10 = vpop.f32.mrb[19].mxu0  ;;  %v3945_v12 = vadd.f32 %v3061_v7, %v435_v57  ;;  %v3957_v18 = vadd.f32 %v3068_v8, %v435_v57 }
 0x32e   :  { %v3943_v11 = vadd.f32 %v1000_v10, %v434_v58  ;;  %v3949_v14 = vadd.f32 %v921_v9, %v434_v58 }
 0x32f   :  { %v1340_v15 = vsel %vm692_vm1, %v3945_v12, -inf  ;;  %v1346_v19 = vsel %vm692_vm1, %v3957_v18, -inf }
 0x330   :  { %v1343_v13 = vsel %vm692_vm1, %v3943_v11, -inf  ;;  %v1337_v16 = vsel %vm692_vm1, %v3949_v14, -inf }
 0x331   :  { %1344 = vmax.xlane.f32.xlu0 %v1343_v13 }
 0x334   :  { %3436 = vrot.lane.b32.xlu1 %v3891_v17, %s3679_s4 }
 0x335   :  { %1341 = vmax.xlane.f32.xlu0 %v1340_v15 }
 0x339   :  { %1338 = vmax.xlane.f32.xlu0 %v1337_v16 }
 0x358   :  { %1347 = vmax.xlane.f32.xlu1 %v1346_v19 }
 0x36a   :  { %v3075_v20 = vpop.f32.mrb[6].mxu1  ;;  %v3082_v21 = vpop.f32.mrb[20].mxu0 }
 0x36b   :  { %v3961_v22 = vadd.f32 %v3082_v21, %v435_v57  ;;  %v1079_v23 = vpop.f32.mrb[7].mxu1  ;;  %v1158_v24 = vpop.f32.mrb[21].mxu0  ;;  %v3965_v26 = vadd.f32 %v3075_v20, %v435_v57 }
 0x36c   :  { %v3963_v25 = vadd.f32 %v1158_v24, %v434_v58  ;;  %v3969_v29 = vadd.f32 %v1079_v23, %v434_v58 }
 0x36d   :  { %v1358_v28 = vsel %vm692_vm1, %v3961_v22, -inf  ;;  %v1352_v36 = vsel %vm692_vm1, %v3965_v26, -inf }
 0x36e   :  { %1359 = vmax.xlane.f32.xlu1 %v1358_v28  ;;  %v1355_v30 = vsel %vm692_vm1, %v3963_v25, -inf  ;;  %v1349_v34 = vsel %vm692_vm1, %v3969_v29, -inf }
 0x36f   :  { %1356 = vmax.xlane.f32.xlu0 %v1355_v30 }
 0x370   :  { %v3096_v31 = vpop.f32.mrb[22].mxu0 }
 0x371   :  { %v3973_v32 = vadd.f32 %v3096_v31, %v435_v57  ;;  %v1316_v33 = vpop.f32.mrb[23].mxu0 }
 0x372   :  { %v3977_v27 = vadd.f32 %v1316_v33, %v434_v58  ;;  %1353 = vmax.xlane.f32.xlu1 %v1352_v36 }
 0x373   :  { %1350 = vmax.xlane.f32.xlu0 %v1349_v34  ;;  %v1370_v35 = vsel %vm692_vm1, %v3973_v32, -inf }
 0x374   :  { %v1367_v38 = vsel %vm692_vm1, %v3977_v27, -inf }
 0x376   :  { %1371 = vmax.xlane.f32.xlu1 %v1370_v35 }
 0x377   :  { %1368 = vmax.xlane.f32.xlu0 %v1367_v38 }
 0x37d   :  { %v3089_v39 = vpop.f32.mrb[8].mxu1 }
 0x37e   :  { %v3985_v41 = vadd.f32 %v3089_v39, %v435_v57  ;;  %v1237_v43 = vpop.f32.mrb[9].mxu1 }
 0x37f   :  { %v3987_v45 = vadd.f32 %v1237_v43, %v434_v58 }
 0x380   :  { %v1364_v46 = vsel %vm692_vm1, %v3985_v41, -inf }
 0x381   :  { %1365 = vmax.xlane.f32.xlu1 %v1364_v46  ;;  %v1361_v47 = vsel %vm692_vm1, %v3987_v45, -inf }
 0x382   :  { %1362 = vmax.xlane.f32.xlu0 %v1361_v47 }
 0x392   :  { %3446 = vrot.lane.b32.xlu1 %v3891_v17, %s3682_s19 }
 0x398   :  { %3441 = vrot.lane.b32.xlu0 %v3891_v17, %s3681_s27 }
 0x3b0   :  { %v1330_v48 = vpop.xlane.xlu1 %1329 }
 0x3b1   :  { %v1374_v49 = vsub.f32 %v3927_v60, %v1330_v48  ;;  %v1327_v40 = vpop.xlane.xlu0 %1326 }
 0x3b2   :  { %v1373_v50 = vsub.f32 %v3929_v62, %v1327_v40 }
 0x3b3   :  { %v1391_v44 = vmul.f32 1.442695, %v1374_v49 }
 0x3b4   :  { %v1389_v51 = vmul.f32 1.442695, %v1373_v50  ;;  %v3437_v52 = vpop.permute.xlu1 %3436 }
 0x3b5   :  { %3465 = vpow2.f32 %v1391_v44  ;;  %v3439_v53 = vunpack.i.h.bf16 %v3437_v52  ;;  %v3438_v37 = vunpack.i.l.bf16 %v3437_v52  ;;  %v1336_v42 = vpop.xlane.xlu0 %1335 }
 0x3b6   :  { %3467 = vpow2.f32 %v1389_v51  ;;  %v1376_v54 = vsub.f32 %v3935_v2, %v1336_v42 }
 0x3b7   :  { %v4000_v55 = vpack.c.bf16 %v3439_v53, %v3438_v37 }
 0x3b8   :  { %v1395_v56 = vmul.f32 1.442695, %v1376_v54 }
 0x3b9   :  { %v1333_v57 = vpop.xlane.xlu0 %1332  ;;  %3266 = vmatprep.subr.bf16.mxu1 %v4000_v55 }
 0x3ba   :  { %3469 = vpow2.f32 %v1395_v56  ;;  %v1375_v58 = vsub.f32 %v3939_v5, %v1333_v57 }
 0x3bc   :  { %v1393_v59 = vmul.f32 1.442695, %v1375_v58 }
 0x3be   :  { %3471 = vpow2.f32 %v1393_v59  ;;  %v1345_v60 = vpop.xlane.xlu0 %1344 }
 0x3bf   :  { %v4004_v61 = vpop.eup %3465  ;;  %v1379_v62 = vsub.f32 %v3943_v11, %v1345_v60 }
 0x3c0   :  { %v4007_v63 = vpop.eup %3467  ;;  %v1424_v0 = vsel %vm692_vm1, %v4004_v61, 0.0 }
 0x3c1   :  { %v1401_v1 = vmul.f32 1.442695, %v1379_v62  ;;  %1425 = vadd.xlane.f32.xlu1 %v1424_v0  ;;  %v1421_v2 = vsel %vm692_vm1, %v4007_v63, 0.0 }
 0x3c2   :  { %1422 = vadd.xlane.f32.xlu0 %v1421_v2  ;;  %v1342_v3 = vpop.xlane.xlu0 %1341 }
 0x3c3   :  { %3473 = vpow2.f32 %v1401_v1 }
 0x3c4   :  { %v4013_v4 = vpop.eup %3469 }
 0x3c5   :  { %v1430_v5 = vsel %vm692_vm1, %v4013_v4, 0.0 }
 0x3c6   :  { %1431 = vadd.xlane.f32.xlu1 %v1430_v5  ;;  %v1339_v6 = vpop.xlane.xlu0 %1338 }
 0x3c7   :  { %v1377_v7 = vsub.f32 %v3949_v14, %v1339_v6  ;;  %v1378_v14 = vsub.f32 %v3945_v12, %v1342_v3 }
 0x3c8   :  { %v4018_v8 = vpop.eup %3471 }
 0x3c9   :  { %v1397_v9 = vmul.f32 1.442695, %v1377_v7  ;;  %v1427_v10 = vsel %vm692_vm1, %v4018_v8, 0.0  ;;  %v1399_v21 = vmul.f32 1.442695, %v1378_v14 }
 0x3ca   :  { %1428 = vadd.xlane.f32.xlu0 %v1427_v10 }
 0x3cb   :  { %3475 = vpow2.f32 %v1397_v9 }
 0x3cd   :  { %v4022_v11 = vpop.eup %3473 }
 0x3ce   :  { %v1439_v13 = vsel %vm692_vm1, %v4022_v11, 0.0 }
 0x3cf   :  { %1440 = vadd.xlane.f32.xlu0 %v1439_v13 }
 0x3d5   :  { %v4026_v15 = vpop.eup %3475 }
 0x3d6   :  { %v1433_v16 = vsel %vm692_vm1, %v4026_v15, 0.0 }
 0x3d7   :  { %1434 = vadd.xlane.f32.xlu0 %v1433_v16 }
 0x3e5   :  { %v1348_v19 = vpop.xlane.xlu1 %1347 }
 0x3e6   :  { %v1380_v20 = vsub.f32 %v3957_v18, %v1348_v19 }
 0x3e8   :  { %v1403_v23 = vmul.f32 1.442695, %v1380_v20 }
 0x3ea   :  { %3477 = vpow2.f32 %v1403_v23 }
 0x3eb   :  { %3479 = vpow2.f32 %v1399_v21 }
 0x3f4   :  { %v4032_v24 = vpop.eup %3477 }
 0x3f5   :  { %v1442_v28 = vsel %vm692_vm1, %v4032_v24, 0.0  ;;  %v4036_v30 = vpop.eup %3479 }
 0x3f6   :  { %1443 = vadd.xlane.f32.xlu1 %v1442_v28  ;;  %v1436_v31 = vsel %vm692_vm1, %v4036_v30, 0.0 }
 0x3fa   :  { %1437 = vadd.xlane.f32.xlu1 %v1436_v31 }
 0x3fb   :  { %v1360_v12 = vpop.xlane.xlu1 %1359 }
 0x3fc   :  { %v1384_v33 = vsub.f32 %v3961_v22, %v1360_v12  ;;  %v1357_v18 = vpop.xlane.xlu0 %1356 }
 0x3fd   :  { %v1383_v36 = vsub.f32 %v3963_v25, %v1357_v18 }
 0x3fe   :  { %v1411_v34 = vmul.f32 1.442695, %v1384_v33 }
 0x3ff   :  { %v1409_v35 = vmul.f32 1.442695, %v1383_v36  ;;  %v1354_v38 = vpop.xlane.xlu1 %1353 }
 0x400   :  { %3481 = vpow2.f32 %v1411_v34  ;;  %v1382_v39 = vsub.f32 %v3965_v26, %v1354_v38  ;;  %v1351_v43 = vpop.xlane.xlu0 %1350 }
 0x401   :  { %3483 = vpow2.f32 %v1409_v35  ;;  %v1381_v47 = vsub.f32 %v3969_v29, %v1351_v43 }
 0x402   :  { %v1407_v46 = vmul.f32 1.442695, %v1382_v39 }
 0x403   :  { %v1372_v48 = vpop.xlane.xlu1 %1371  ;;  %v1405_v40 = vmul.f32 1.442695, %v1381_v47 }
 0x404   :  { %3485 = vpow2.f32 %v1407_v46  ;;  %v1388_v49 = vsub.f32 %v3973_v32, %v1372_v48  ;;  %v1369_v44 = vpop.xlane.xlu0 %1368 }
 0x405   :  { %v1387_v6 = vsub.f32 %v3977_v27, %v1369_v44 }
 0x406   :  { %v1419_v22 = vmul.f32 1.442695, %v1388_v49 }
 0x407   :  { %v1417_v7 = vmul.f32 1.442695, %v1387_v6  ;;  %v2151_v6 = vld [vmem:[#allocation10 + $0x10] sm:$0xff] }
 0x408   :  { %3487 = vpow2.f32 %v1419_v22 }
 0x409   :  { %3489 = vpow2.f32 %v1405_v40 }
 0x40a   :  { %v4045_v50 = vpop.eup %3481 }
 0x40b   :  { %v4047_v25 = vpop.eup %3483  ;;  %v1454_v26 = vsel %vm692_vm1, %v4045_v50, 0.0 }
 0x40c   :  { %1455 = vadd.xlane.f32.xlu1 %v1454_v26  ;;  %v1451_v29 = vsel %vm692_vm1, %v4047_v25, 0.0 }
 0x40d   :  { %1452 = vadd.xlane.f32.xlu0 %v1451_v29 }
 0x40e   :  { %v4053_v51 = vpop.eup %3485  ;;  %v1366_v32 = vpop.xlane.xlu1 %1365 }
 0x40f   :  { %v1386_v52 = vsub.f32 %v3985_v41, %v1366_v32  ;;  %v1363_v53 = vpop.xlane.xlu0 %1362  ;;  %v1448_v37 = vsel %vm692_vm1, %v4053_v51, 0.0 }
 0x410   :  { %v1385_v42 = vsub.f32 %v3987_v45, %v1363_v53  ;;  %1449 = vadd.xlane.f32.xlu1 %v1448_v37 }
 0x411   :  { %v1415_v54 = vmul.f32 1.442695, %v1386_v52 }
 0x412   :  { %v4059_v56 = vpop.eup %3487  ;;  %v1413_v57 = vmul.f32 1.442695, %v1385_v42  ;;  %v3447_v13 = vpop.permute.xlu1 %3446 }
 0x413   :  { %3491 = vpow2.f32 %v1415_v54  ;;  %v3442_v58 = vpop.permute.xlu0 %3441  ;;  %v1466_v59 = vsel %vm692_vm1, %v4059_v56, 0.0  ;;  %v4063_v60 = vpop.eup %3489  ;;  %v3449_v23 = vunpack.i.h.bf16 %v3447_v13  ;;  %v3448_v28 = vunpack.i.l.bf16 %v3447_v13 }
 0x414   :  { %v3444_v62 = vunpack.i.h.bf16 %v3442_v58  ;;  %v3443_v41 = vunpack.i.l.bf16 %v3442_v58  ;;  %1467 = vadd.xlane.f32.xlu1 %v1466_v59  ;;  %3493 = vpow2.f32 %v1413_v57  ;;  %v1445_v45 = vsel %vm692_vm1, %v4063_v60, 0.0 }
 0x415   :  { %3495 = vpow2.f32 %v1417_v7  ;;  %v3273_v18 = vpack.c.bf16 %v3449_v23, %v3448_v28  ;;  %v2152_v7 = vld [vmem:[#allocation10 + $0x18] sm:$0xff]  ;;  %v2153_v28 = vld [vmem:[#allocation10 + $0x20] sm:$0xff] }
 0x416   :  { %v3269_v0 = vpack.c.bf16 %v3444_v62, %v3443_v41  ;;  %v3293_v13 = vpack.c.bf16 %v2152_v7, %v2151_v6 }
 0x418   :  { %1446 = vadd.xlane.f32.xlu1 %v1445_v45  ;;  %3270 = vmatprep.subr.bf16.mxu0 %v3269_v0 }
 0x41d   :  { %v4067_v1 = vpop.eup %3491 }
 0x41e   :  { %v1460_v2 = vsel %vm692_vm1, %v4067_v1, 0.0  ;;  %v4071_v3 = vpop.eup %3493 }
 0x41f   :  { %1461 = vadd.xlane.f32.xlu1 %v1460_v2  ;;  %v1457_v5 = vsel %vm692_vm1, %v4071_v3, 0.0  ;;  %v4080_v9 = vpop.eup %3495 }
 0x420   :  { %v1463_v10 = vsel %vm692_vm1, %v4080_v9, 0.0 }
 0x423   :  { %3451 = vrot.lane.b32.xlu0 %v3891_v17, %s3683_s20  ;;  %1458 = vadd.xlane.f32.xlu1 %v1457_v5 }
 0x434   :  { %3456 = vrot.lane.b32.xlu1 %v3891_v17, %s3685_s22 }
 0x442   :  { %1464 = vadd.xlane.f32.xlu0 %v1463_v10 }
 0x44e   :  { %v1426_v16 = vpop.xlane.xlu1 %1425 }
 0x44f   :  { %3497 = vrcp.f32 %v1426_v16  ;;  %v1423_v14 = vpop.xlane.xlu0 %1422 }
 0x450   :  { %3499 = vrcp.f32 %v1423_v14 }
 0x453   :  { %v1432_v19 = vpop.xlane.xlu1 %1431 }
 0x454   :  { %3501 = vrcp.f32 %v1432_v19 }
 0x457   :  { %v1429_v20 = vpop.xlane.xlu0 %1428 }
 0x458   :  { %3503 = vrcp.f32 %v1429_v20  ;;  %3461 = vrot.lane.b32.xlu0 %v3891_v17, %s3684_s21 }
 0x459   :  { %v3498_v27 = vpop.eup %3497 }
 0x45a   :  { %v3500_v21 = vpop.eup %3499  ;;  %v1486_v12 = vmul.f32 %v3498_v27, %v4004_v61 }
 0x45b   :  { %v1485_v31 = vmul.f32 %v3500_v21, %v4007_v63 }
 0x45c   :  { %v1441_v33 = vpop.xlane.xlu0 %1440 }
 0x45d   :  { %3505 = vrcp.f32 %v1441_v33  ;;  %3101 = vmatprep.mubr.msk.f32.mxu1 %vm692_vm1, %v1485_v31  ;;  %v2154_v31 = vld [vmem:[#allocation10 + $0x28] sm:$0xff] }
 0x45e   :  { %3102 = vmatmul.mubr.msk.f32.vlgmr.msra.gmra.mrb[10].mxu1 %vm692_vm1, %v1486_v12  ;;  %v3502_v36 = vpop.eup %3501 }
 0x45f   :  { %3268 = vmatpush3.bf16.msra.mxu1 %v4000_v55  ;;  %v1488_v35 = vmul.f32 %v3502_v36, %v4013_v4  ;;  %v2155_v36 = vld [vmem:[#allocation10 + $0x30] sm:$0xff] }
 0x460   :  { %3274 = vmatprep.subr.bf16.mxu1 %v3273_v18 }
 0x462   :  { %v3504_v17 = vpop.eup %3503 }
 0x463   :  { %v1487_v34 = vmul.f32 %v3504_v17, %v4018_v8  ;;  %v2156_v17 = vld [vmem:[#allocation10 + $0x38] sm:$0xff] }
 0x464   :  { %v1435_v38 = vpop.xlane.xlu0 %1434 }
 0x465   :  { %3507 = vrcp.f32 %v1435_v38  ;;  %3108 = vmatprep.mubr.msk.f32.mxu0 %vm692_vm1, %v1487_v34 }
 0x466   :  { %3109 = vmatmul.mubr.msk.f32.vlgmr.msra.gmra.mrb[24].mxu0 %vm692_vm1, %v1488_v35 }
 0x467   :  { %v3506_v61 = vpop.eup %3505  ;;  %3272 = vmatpush3.bf16.msra.mxu0 %v3269_v0 }
 0x468   :  { %v1491_v63 = vmul.f32 %v3506_v61, %v4022_v11  ;;  %v2157_v61 = vld [vmem:[#allocation10 + $0x40] sm:$0xff] }
 0x46a   :  { %3122 = vmatprep.mubr.msk.f32.mxu0 %vm692_vm1, %v1491_v63  ;;  %v2158_v63 = vld [vmem:[#allocation10 + $0x48] sm:$0xff] }
 0x46f   :  { %v3508_v55 = vpop.eup %3507 }
 0x470   :  { %v1489_v39 = vmul.f32 %v3508_v55, %v4026_v15 }
 0x472   :  { %3115 = vmatprep.mubr.msk.f32.mxu1 %vm692_vm1, %v1489_v39 }
 0x483   :  { %v1444_v8 = vpop.xlane.xlu1 %1443 }
 0x484   :  { %3509 = vrcp.f32 %v1444_v8  ;;  %v3305_v8 = vpack.c.bf16 %v2158_v63, %v2157_v61 }
 0x487   :  { %v1438_v4 = vpop.xlane.xlu1 %1437 }
 0x488   :  { %3511 = vrcp.f32 %v1438_v4  ;;  %v2159_v4 = vld [vmem:[#allocation10 + $0x50] sm:$0xff] }
 0x48e   :  { %v3510_v43 = vpop.eup %3509 }
 0x48f   :  { %v1492_v46 = vmul.f32 %v3510_v43, %v4032_v24  ;;  %v2160_v43 = vld [vmem:[#allocation10 + $0x58] sm:$0xff] }
 0x491   :  { %3123 = vmatmul.mubr.msk.f32.vlgmr.msra.gmra.mrb[26].mxu0 %vm692_vm1, %v1492_v46  ;;  %v3309_v46 = vpack.c.bf16 %v2160_v43, %v2159_v4 }
 0x492   :  { %v3512_v47 = vpop.eup %3511 }
 0x493   :  { %v1490_v48 = vmul.f32 %v3512_v47, %v4036_v30 }
 0x495   :  { %3116 = vmatmul.mubr.msk.f32.vlgmr.msra.gmra.mrb[12].mxu1 %vm692_vm1, %v1490_v48 }
 0x496   :  { %3276 = vmatpush3.bf16.msra.mxu1 %v3273_v18  ;;  %v3297_v18 = vpack.c.bf16 %v2154_v31, %v2153_v28 }
 0x499   :  { %v1456_v11 = vpop.xlane.xlu1 %1455 }
 0x49a   :  { %3513 = vrcp.f32 %v1456_v11  ;;  %v1453_v15 = vpop.xlane.xlu0 %1452  ;;  %v2161_v11 = vld [vmem:[#allocation10 + $0x60] sm:$0xff] }
 0x49b   :  { %3515 = vrcp.f32 %v1453_v15  ;;  %v2162_v15 = vld [vmem:[#allocation10 + $0x68] sm:$0xff] }
 0x49d   :  { %v1450_v49 = vpop.xlane.xlu1 %1449 }
 0x49e   :  { %v3452_v40 = vpop.permute.xlu0 %3451  ;;  %3517 = vrcp.f32 %v1450_v49 }
 0x49f   :  { %v3454_v22 = vunpack.i.h.bf16 %v3452_v40  ;;  %v3453_v44 = vunpack.i.l.bf16 %v3452_v40 }
 0x4a1   :  { %v3277_v26 = vpack.c.bf16 %v3454_v22, %v3453_v44  ;;  %v1468_v29 = vpop.xlane.xlu1 %1467  ;;  %v3313_v22 = vpack.c.bf16 %v2162_v15, %v2161_v11  ;;  %v2163_v44 = vld [vmem:[#allocation10 + $0x70] sm:$0xff] }
 0x4a3   :  { %3278 = vmatprep.subr.bf16.mxu0 %v3277_v26 }
 0x4a4   :  { %v3514_v24 = vpop.eup %3513  ;;  %3280 = vmatpush3.bf16.msra.mxu0 %v3277_v26  ;;  %v2164_v26 = vld [vmem:[#allocation10 + $0x78] sm:$0xff] }
 0x4a5   :  { %v3516_v32 = vpop.eup %3515  ;;  %v1447_v52 = vpop.xlane.xlu1 %1446  ;;  %v1496_v53 = vmul.f32 %v3514_v24, %v4045_v50  ;;  %v2149_v50 = vld [vmem:[#allocation10] sm:$0xff] }
 0x4a6   :  { %3519 = vrcp.f32 %v1447_v52  ;;  %v1495_v30 = vmul.f32 %v3516_v32, %v4047_v25  ;;  %v2150_v25 = vld [vmem:[#allocation10 + $0x8] sm:$0xff] }
 0x4a7   :  { %v3289_v2 = vpack.c.bf16 %v2150_v25, %v2149_v50 }
 0x4a8   :  { %3136 = vmatprep.mubr.msk.f32.mxu0 %vm692_vm1, %v1495_v30  ;;  %v3518_v42 = vpop.eup %3517 }
 0x4a9   :  { %3137 = vmatmul.mubr.msk.f32.vlgmr.msra.gmra.mrb[28].mxu0 %vm692_vm1, %v1496_v53  ;;  %v1494_v59 = vmul.f32 %v3518_v42, %v4053_v51  ;;  %v2917_v53 = vld [vmem:[%s4160_s5] ss:$0 sm:$0xff] }
 0x4ac   :  { %v1462_v37 = vpop.xlane.xlu1 %1461 }
 0x4ad   :  { %3521 = vrcp.f32 %v1462_v37 }
 0x4b0   :  { %v3520_v54 = vpop.eup %3519  ;;  %v1459_v57 = vpop.xlane.xlu1 %1458 }
 0x4b1   :  { %3523 = vrcp.f32 %v1459_v57  ;;  %v1493_v58 = vmul.f32 %v3520_v54, %v4063_v60 }
 0x4b2   :  { %3525 = vrcp.f32 %v1468_v29  ;;  %v3317_v29 = vpack.c.bf16 %v2164_v26, %v2163_v44 }
 0x4b3   :  { %3129 = vmatprep.mubr.msk.f32.mxu1 %vm692_vm1, %v1493_v58 }
 0x4b4   :  { %v3457_v62 = vpop.permute.xlu1 %3456  ;;  %3130 = vmatmul.mubr.msk.f32.vlgmr.msra.gmra.mrb[14].mxu1 %vm692_vm1, %v1494_v59 }
 0x4b5   :  { %v3459_v41 = vunpack.i.h.bf16 %v3457_v62  ;;  %v3458_v0 = vunpack.i.l.bf16 %v3457_v62 }
 0x4b7   :  { %v3281_v45 = vpack.c.bf16 %v3459_v41, %v3458_v0  ;;  %v3522_v5 = vpop.eup %3521 }
 0x4b8   :  { %v1498_v60 = vmul.f32 %v3522_v5, %v4067_v1 }
 0x4b9   :  { %3282 = vmatprep.subr.bf16.mxu1 %v3281_v45 }
 0x4ba   :  { %3284 = vmatpush3.bf16.msra.mxu1 %v3281_v45 }
 0x4bb   :  { %v3524_v10 = vpop.eup %3523  ;;  %3290 = vmatprep.subr.bf16.mxu1 %v3289_v2 }
 0x4bc   :  { %v1497_v51 = vmul.f32 %v3524_v10, %v4071_v3  ;;  %v3526_v21 = vpop.eup %3525 }
 0x4bd   :  { %v1500_v23 = vmul.f32 %v3526_v21, %v4059_v56  ;;  %v3301_v56 = vpack.c.bf16 %v2156_v17, %v2155_v36 }
 0x4be   :  { %3143 = vmatprep.mubr.msk.f32.mxu1 %vm692_vm1, %v1497_v51 }
 0x4bf   :  { %3144 = vmatmul.mubr.msk.f32.vlgmr.msra.gmra.mrb[16].mxu1 %vm692_vm1, %v1498_v60 }
 0x4c0   :  { %3292 = vmatpush3.bf16.msra.mxu1 %v3289_v2 }
 0x4c1   :  { %3294 = vmatprep.subr.bf16.mxu1 %v3293_v13 }
 0x4cf   :  { %v1465_v16 = vpop.xlane.xlu0 %1464 }
 0x4d0   :  { %3527 = vrcp.f32 %v1465_v16 }
 0x4d3   :  { %v3462_v14 = vpop.permute.xlu0 %3461 }
 0x4d4   :  { %v3464_v19 = vunpack.i.h.bf16 %v3462_v14  ;;  %v3463_v20 = vunpack.i.l.bf16 %v3462_v14 }
 0x4d6   :  { %v3285_v27 = vpack.c.bf16 %v3464_v19, %v3463_v20 }
 0x4d8   :  { %3286 = vmatprep.subr.bf16.mxu0 %v3285_v27 }
 0x4d9   :  { %3288 = vmatpush3.bf16.msra.mxu0 %v3285_v27 }
 0x4da   :  { %v3528_v3 = vpop.eup %3527 }
 0x4db   :  { %v1499_v1 = vmul.f32 %v3528_v3, %v4080_v9 }
 0x4dd   :  { %3150 = vmatprep.mubr.msk.f32.mxu0 %vm692_vm1, %v1499_v1 }
 0x4de   :  { %3151 = vmatmul.mubr.msk.f32.vlgmr.msra.gmra.mrb[30].mxu0 %vm692_vm1, %v1500_v23 }
 0x531   :  { %v3103_v12 = vpop.f32.mrb[10].mxu1 }
 0x532   :  { %v1573_v33 = vpop.f32.mrb[11].mxu1 }
 0x533   :  { %3157 = vmatprep.mubr.msk.f32.mxu1 %vm692_vm1, %v1573_v33 }
 0x534   :  { %3158 = vmatmul.mubr.msk.f32.vlgmr.msra.gmra.mrb[18].mxu1 %vm692_vm1, %v3103_v12 }
 0x535   :  { %3296 = vmatpush3.bf16.msra.mxu1 %v3293_v13 }
 0x536   :  { %3298 = vmatprep.subr.bf16.mxu1 %v3297_v18 }
 0x539   :  { %v3110_v9 = vpop.f32.mrb[24].mxu0 }
 0x53a   :  { %v1654_v34 = vpop.f32.mrb[25].mxu0 }
 0x53b   :  { %3164 = vmatprep.mubr.msk.f32.mxu1 %vm692_vm1, %v1654_v34 }
 0x53c   :  { %3165 = vmatmul.mubr.msk.f32.vlgmr.msra.gmra.mrb[18].mxu1 %vm692_vm1, %v3110_v9 }
 0x53d   :  { %3300 = vmatpush3.bf16.msra.mxu1 %v3297_v18 }
 0x53e   :  { %3302 = vmatprep.subr.bf16.mxu1 %v3301_v56 }
 0x564   :  { %v3124_v35 = vpop.f32.mrb[26].mxu0 }
 0x565   :  { %v1816_v38 = vpop.f32.mrb[27].mxu0 }
 0x568   :  { %v3117_v55 = vpop.f32.mrb[12].mxu1 }
 0x569   :  { %v1735_v39 = vpop.f32.mrb[13].mxu1 }
 0x56a   :  { %3171 = vmatprep.mubr.msk.f32.mxu1 %vm692_vm1, %v1735_v39 }
 0x56b   :  { %3172 = vmatmul.mubr.msk.f32.vlgmr.msra.gmra.mrb[18].mxu1 %vm692_vm1, %v3117_v55 }
 0x56c   :  { %3178 = vmatprep.mubr.msk.f32.mxu1 %vm692_vm1, %v1816_v38  ;;  %3304 = vmatpush3.bf16.msra.mxu1 %v3301_v56 }
 0x56d   :  { %3306 = vmatprep.subr.bf16.mxu1 %v3305_v8 }
 0x573   :  { %3179 = vmatmul.mubr.msk.f32.vlgmr.msra.gmra.mrb[18].mxu1 %vm692_vm1, %v3124_v35 }
 0x574   :  { %3308 = vmatpush3.bf16.msra.mxu1 %v3305_v8 }
 0x575   :  { %3310 = vmatprep.subr.bf16.mxu1 %v3309_v46 }
 0x57c   :  { %v3138_v47 = vpop.f32.mrb[28].mxu0 }
 0x57d   :  { %v1978_v48 = vpop.f32.mrb[29].mxu0 }
 0x587   :  { %v3131_v49 = vpop.f32.mrb[14].mxu1 }
 0x588   :  { %v1897_v40 = vpop.f32.mrb[15].mxu1 }
 0x589   :  { %3185 = vmatprep.mubr.msk.f32.mxu1 %vm692_vm1, %v1897_v40 }
 0x58a   :  { %3186 = vmatmul.mubr.msk.f32.vlgmr.msra.gmra.mrb[18].mxu1 %vm692_vm1, %v3131_v49 }
 0x58b   :  { %3192 = vmatprep.mubr.msk.f32.mxu1 %vm692_vm1, %v1978_v48  ;;  %3312 = vmatpush3.bf16.msra.mxu1 %v3309_v46 }
 0x58c   :  { %3314 = vmatprep.subr.bf16.mxu1 %v3313_v22 }
 0x592   :  { %v3145_v24 = vpop.f32.mrb[16].mxu1  ;;  %3193 = vmatmul.mubr.msk.f32.vlgmr.msra.gmra.mrb[18].mxu1 %vm692_vm1, %v3138_v47 }
 0x593   :  { %v2059_v32 = vpop.f32.mrb[17].mxu1  ;;  %3316 = vmatpush3.bf16.msra.mxu1 %v3313_v22 }
 0x594   :  { %3199 = vmatprep.mubr.msk.f32.mxu1 %vm692_vm1, %v2059_v32  ;;  %3318 = vmatprep.subr.bf16.mxu1 %v3317_v29 }
 0x59a   :  { %3200 = vmatmul.mubr.msk.f32.vlgmr.msra.gmra.mrb[18].mxu1 %vm692_vm1, %v3145_v24 }
 0x59b   :  { %3320 = vmatpush3.bf16.msra.mxu1 %v3317_v29 }
 0x5b1   :  { %v3152_v52 = vpop.f32.mrb[30].mxu0 }
 0x5b2   :  { %v2140_v30 = vpop.f32.mrb[31].mxu0 }
 0x5b3   :  { %3206 = vmatprep.mubr.msk.f32.mxu1 %vm692_vm1, %v2140_v30 }
 0x5b4   :  { %3207 = vmatmul.mubr.msk.f32.vlgmr.msra.gmra.mrb[18].mxu1 %vm692_vm1, %v3152_v52 }
 0x687   :  { %v3208_v37 = vpop.f32.mrb[18].mxu1 }
 0x688   :  { %v2835_v42 = vadd.f32 %v3208_v37, %v2917_v53  ;;  %v2804_v54 = vpop.f32.mrb[19].mxu1 }
 0x689   :  { %v2834_v57 = vadd.f32 %v2917_v53, %v2804_v54 }
 0x68a   :  { %2837 = vst.msk [vmem:[#allocation11 + $0x8] sm:$0xff] %vm113_vm0, %v2835_v42 }
 0x68b   :  { %2836 = vst.msk [vmem:[#allocation11] sm:$0xff] %vm113_vm0, %v2834_v57 }
 0x68c   :  { %3650 = shalt.err (!%p3647_p2)
}
 0x68d   :  { %s3651_s8 = scalar_lea.hbm %s4162_s7, 256 }
 0x68e   :  { %p3652_p3 = scmp.ne.s32.totalorder %s4162_s7, %s3651_s8  ;;  %p3655_p4 = scmp.lt.u32.totalorder %s3651_s8, %s4162_s7 }
 0x690   :  { %p3657_p5 = pnand %p3655_p4, %p3652_p3 }
 0x692   :  { %3660 = shalt.err (!%p3657_p5)
}
 0x693   :  { %2849 = dma.vmem_to_hbm [thread:$0]  %s2844_s28, 256, %s4162_s7, [#allocation4], %s3671_s13, %s3671_s13, %s3672_s14  }
 0x694   :  { %3667 = dma.done.wait [#allocation4], 256  }
 0x695   :  { %3668 = vsyncadd [#allocation4], 4294967040 }
 0x696   :  { %2853 = vsyncpa [#allocation3], 1 }
 0x697   :  { %2854 = vsyncpa [#allocation6], 1 }
 0x698   :  { %2855 = vsyncpa [#allocation9], 1 }
 0x699   :  { %2856 = vsyncpa [#allocation4], 1 }

</bundles_post_ra>
